<compile_context>
chip_gen: v7x
topology: tpu7x:2x2x1
jax: 0.10.0
libtpu: 0.0.40
codegen_flags: <defaults>
</compile_context>

<pallas_src>
import jax
import jax.numpy as jnp
import numpy as np
from jax import lax
from jax.experimental import pallas as pl
from jax.experimental.pallas import tpu as pltpu


# ----------------------------- Pallas kernel ------------------------------ #
def _spectral_mul_kernel(a_ref, w_ref, o_ref):
    # a_ref: (2, Ci, B_blk, Mp)   [axis 0: real/imag]
    # w_ref: (2, Ci, Co_blk, Mp)
    # o_ref: (2, B_blk, Co_blk, Mp)
    ci = a_ref.shape[1]
    b_blk = a_ref.shape[2]
    co_blk = w_ref.shape[2]
    mp = a_ref.shape[3]

    def body(i, carry):
        acc_r, acc_i = carry
        ar = a_ref[0, i][:, None, :]     # (B_blk, 1, Mp)
        ai = a_ref[1, i][:, None, :]
        wr = w_ref[0, i][None, :, :]     # (1, Co_blk, Mp)
        wi = w_ref[1, i][None, :, :]
        acc_r = acc_r + (ar * wr - ai * wi)
        acc_i = acc_i + (ai * wr + ar * wi)
        return acc_r, acc_i

    zero = jnp.zeros((b_blk, co_blk, mp), jnp.float32)
    acc_r, acc_i = lax.fori_loop(0, ci, body, (zero, zero), unroll=True)

    o_ref[0] = acc_r.astype(o_ref.dtype)
    o_ref[1] = acc_i.astype(o_ref.dtype)


def _pick_block(n, target):
    """Block size for a dim sitting in the second-to-last slot of a block:
    legal choices are the full dim, or a multiple-of-8 divisor of n."""
    if n <= target:
        return n
    for c in range(target - target % 8, 7, -8):
        if n % c == 0:
            return c
    return n


def spectral_mul_pallas(a_low, a_high, w1, w2):
    """Both-band complex contraction 'bixy,ioxy->boxy' in one Pallas call.

    a_low/a_high: (B, Ci, m1, m2) complex64 (the two retained frequency bands)
    w1/w2:        (Ci, Co, m1, m2, 2) float32 (real/imag stacked on last axis)
    returns (out_low, out_high): (B, Co, m1, m2) complex64 each.
    """
    B, Ci, m1, m2 = a_low.shape
    Co = w1.shape[1]
    M = m1 * m2
    M2 = 2 * M                                   # both bands on the lane axis
    Mp = max(128, ((M2 + 127) // 128) * 128)     # lane-dense / unmasked stores

    def pack_act(lo, hi):
        ar = jnp.concatenate([jnp.real(lo).reshape(B, Ci, M),
                              jnp.real(hi).reshape(B, Ci, M)], axis=-1)
        ai = jnp.concatenate([jnp.imag(lo).reshape(B, Ci, M),
                              jnp.imag(hi).reshape(B, Ci, M)], axis=-1)
        a = jnp.stack([ar, ai], axis=0)          # (2, B, Ci, 2M)
        a = jnp.transpose(a, (0, 2, 1, 3))       # (2, Ci, B, 2M): Ci leading -> cheap dyn index
        a = jnp.pad(a, ((0, 0), (0, 0), (0, 0), (0, Mp - M2)))
        return a.astype(jnp.float32)

    def pack_w(wa, wb):
        wr = jnp.concatenate([wa[..., 0].reshape(Ci, Co, M),
                              wb[..., 0].reshape(Ci, Co, M)], axis=-1)
        wi = jnp.concatenate([wa[..., 1].reshape(Ci, Co, M),
                              wb[..., 1].reshape(Ci, Co, M)], axis=-1)
        w = jnp.stack([wr, wi], axis=0)          # (2, Ci, Co, 2M)
        w = jnp.pad(w, ((0, 0), (0, 0), (0, 0), (0, Mp - M2)))
        return w.astype(jnp.float32)

    a_packed = pack_act(a_low, a_high)           # (2, Ci, B, Mp)
    w_packed = pack_w(w1, w2)                    # (2, Ci, Co, Mp)

    # Keep f32 compute (safe on v5e which has no bf16 VPU).
    b_blk = _pick_block(B, 8)
    co_blk = _pick_block(Co, 32)
    grid = (B // b_blk, Co // co_blk)

    cost = pl.CostEstimate(
        flops=8 * B * Ci * Co * M2,
        transcendentals=0,
        bytes_accessed=4 * (a_packed.size + w_packed.size + 2 * B * Co * Mp),
    )

    out = pl.pallas_call(
        _spectral_mul_kernel,
        out_shape=jax.ShapeDtypeStruct((2, B, Co, Mp), jnp.float32),
        grid_spec=pltpu.PrefetchScalarGridSpec(
            num_scalar_prefetch=0,
            grid=grid,
            in_specs=[
                pl.BlockSpec((2, Ci, b_blk, Mp), lambda b, c: (0, 0, b, 0)),
                pl.BlockSpec((2, Ci, co_blk, Mp), lambda b, c: (0, 0, c, 0)),
            ],
            out_specs=pl.BlockSpec((2, b_blk, co_blk, Mp),
                                   lambda b, c: (0, b, c, 0)),
        ),
        compiler_params=pltpu.CompilerParams(
            dimension_semantics=("parallel", "parallel")),
        cost_estimate=cost,
    )(a_packed, w_packed)

    o_r = out[0, :, :, :M2]
    o_i = out[1, :, :, :M2]
    out_lo = (o_r[..., :M] + 1j * o_i[..., :M]).reshape(B, Co, m1, m2)
    out_hi = (o_r[..., M:] + 1j * o_i[..., M:]).reshape(B, Co, m1, m2)
    return out_lo, out_hi


# ------------------------------ Module port -------------------------------- #
class SpectralConv2dPallas:
    def __init__(self, in_channels, out_channels, modes1, modes2, key):
        self.in_channels = in_channels
        self.out_channels = out_channels
        self.modes1 = modes1
        self.modes2 = modes2
        scale = 1.0 / (in_channels * out_channels)
        k1, k2 = jax.random.split(key)
        # matches torch: scale * rand(Ci, Co, m1, m2, 2), uniform [0, 1)
        self.weights1 = scale * jax.random.uniform(
            k1, (in_channels, out_channels, modes1, modes2, 2), jnp.float32)
        self.weights2 = scale * jax.random.uniform(
            k2, (in_channels, out_channels, modes1, modes2, 2), jnp.float32)

    def __call__(self, x):
        # x: (B, C_in, H, W) float32 (NCHW, as in PyTorch)
        B, C, H, W = x.shape
        m1, m2 = self.modes1, self.modes2
        Wf = W // 2 + 1

        # TODO(synk): FFT stays in plain JAX; no Pallas FFT primitive.
        x_ft = jnp.fft.rfft2(x, norm="ortho")            # (B, C, H, Wf) c64

        a_lo = x_ft[:, :, :m1, :m2]
        a_hi = x_ft[:, :, H - m1:, :m2]

        out_lo, out_hi = spectral_mul_pallas(a_lo, a_hi,
                                             self.weights1, self.weights2)

        # Note: the torch reference allocates out_ft with `in_channels`
        # channels and only works when in_channels == out_channels; using
        # out_channels here is identical in that (assumed) case.
        out_ft = jnp.zeros((B, self.out_channels, H, Wf), jnp.complex64)
        out_ft = out_ft.at[:, :, :m1, :m2].set(out_lo)
        out_ft = out_ft.at[:, :, H - m1:, :m2].set(out_hi)

        return jnp.fft.irfft2(out_ft, s=(H, W), norm="ortho")


# ----------------------------- Pure-JAX reference --------------------------- #
def _compl_mul2d_ref(a, w):
    # a: (B, Ci, m1, m2) complex ; w: (Ci, Co, m1, m2, 2)
    wc = w[..., 0] + 1j * w[..., 1]
    return jnp.einsum("bixy,ioxy->boxy", a, wc)


def _forward_ref(mod, x):
    B, C, H, W = x.shape
    m1, m2 = mod.modes1, mod.modes2
    Wf = W // 2 + 1
    x_ft = jnp.fft.rfft2(x, norm="ortho")
    out_ft = jnp.zeros((B, mod.out_channels, H, Wf), jnp.complex64)
    out_ft = out_ft.at[:, :, :m1, :m2].set(
        _compl_mul2d_ref(x_ft[:, :, :m1, :m2], mod.weights1))
    out_ft = out_ft.at[:, :, H - m1:, :m2].set(
        _compl_mul2d_ref(x_ft[:, :, H - m1:, :m2], mod.weights2))
    return jnp.fft.irfft2(out_ft, s=(H, W), norm="ortho")


# --------------------------------- main ------------------------------------ #
if __name__ == "__main__":
    key = jax.random.PRNGKey(0)
    k_x, k_w = jax.random.split(key)

    B, C_in, C_out, H, W = 2, 4, 4, 16, 16
    modes1, modes2 = 4, 4

    x = jax.random.normal(k_x, (B, C_in, H, W), jnp.float32)

    mod = SpectralConv2dPallas(C_in, C_out, modes1, modes2, k_w)

    y = jax.block_until_ready(mod(x))
    y_ref = jax.block_until_ready(_forward_ref(mod, x))

    assert y.shape == (B, C_out, H, W)
    assert np.allclose(np.asarray(y), np.asarray(y_ref), atol=1e-5, rtol=1e-5)

    print("KERNEL_OK")
</pallas_src>

<mosaic_0001>
module attributes {stable_mosaic.version = 11 : i64} {
  func.func @_spectral_mul_kernel(%arg0: i32, %arg1: i32, %arg2: memref<2x4x2x128xf32, #tpu.memory_space<vmem>>, %arg3: memref<2x4x4x128xf32, #tpu.memory_space<vmem>>, %arg4: memref<2x2x4x128xf32, #tpu.memory_space<vmem>>) attributes {dimension_semantics = [#tpu.dimension_semantics<parallel>, #tpu.dimension_semantics<parallel>], iteration_bounds = array<i64: 1, 1>, scalar_prefetch = 0 : i64, scratch_operands = 0 : i64, tpu.core_type = #tpu.core_type<tc>, window_params = [{transform_indices = @transform_0, window_bounds = array<i64: 2, 4, 2, 128>}, {transform_indices = @transform_1, window_bounds = array<i64: 2, 4, 4, 128>}, {transform_indices = @transform_2, window_bounds = array<i64: 2, 2, 4, 128>}]} {
    %cst = arith.constant 0.000000e+00 : f32
    %0 = vector.broadcast %cst : f32 to vector<2x4x128xf32>
    %c0_i32 = arith.constant 0 : i32
    %c0 = arith.constant 0 : index
    %1 = arith.index_cast %c0_i32 : i32 to index
    %c0_0 = arith.constant 0 : index
    %c0_1 = arith.constant 0 : index
    %2 = vector.load %arg2[%c0, %1, %c0_0, %c0_1] : memref<2x4x2x128xf32, #tpu.memory_space<vmem>>, vector<1x1x2x128xf32>
    %3 = vector.shape_cast %2 : vector<1x1x2x128xf32> to vector<2x128xf32>
    %4 = vector.shape_cast %3 : vector<2x128xf32> to vector<2x1x128xf32>
    %c1 = arith.constant 1 : index
    %5 = arith.index_cast %c0_i32 : i32 to index
    %c0_2 = arith.constant 0 : index
    %c0_3 = arith.constant 0 : index
    %6 = vector.load %arg2[%c1, %5, %c0_2, %c0_3] : memref<2x4x2x128xf32, #tpu.memory_space<vmem>>, vector<1x1x2x128xf32>
    %7 = vector.shape_cast %6 : vector<1x1x2x128xf32> to vector<2x128xf32>
    %8 = vector.shape_cast %7 : vector<2x128xf32> to vector<2x1x128xf32>
    %c0_4 = arith.constant 0 : index
    %9 = arith.index_cast %c0_i32 : i32 to index
    %c0_5 = arith.constant 0 : index
    %c0_6 = arith.constant 0 : index
    %10 = vector.load %arg3[%c0_4, %9, %c0_5, %c0_6] : memref<2x4x4x128xf32, #tpu.memory_space<vmem>>, vector<1x1x4x128xf32>
    %11 = vector.shape_cast %10 : vector<1x1x4x128xf32> to vector<4x128xf32>
    %12 = vector.shape_cast %11 : vector<4x128xf32> to vector<1x4x128xf32>
    %c1_7 = arith.constant 1 : index
    %13 = arith.index_cast %c0_i32 : i32 to index
    %c0_8 = arith.constant 0 : index
    %c0_9 = arith.constant 0 : index
    %14 = vector.load %arg3[%c1_7, %13, %c0_8, %c0_9] : memref<2x4x4x128xf32, #tpu.memory_space<vmem>>, vector<1x1x4x128xf32>
    %15 = vector.shape_cast %14 : vector<1x1x4x128xf32> to vector<4x128xf32>
    %16 = vector.shape_cast %15 : vector<4x128xf32> to vector<1x4x128xf32>
    %17 = vector.broadcast %4 : vector<2x1x128xf32> to vector<2x4x128xf32>
    %18 = vector.broadcast %12 : vector<1x4x128xf32> to vector<2x4x128xf32>
    %19 = arith.mulf %17, %18 : vector<2x4x128xf32>
    %20 = vector.broadcast %8 : vector<2x1x128xf32> to vector<2x4x128xf32>
    %21 = vector.broadcast %16 : vector<1x4x128xf32> to vector<2x4x128xf32>
    %22 = arith.mulf %20, %21 : vector<2x4x128xf32>
    %23 = arith.subf %19, %22 : vector<2x4x128xf32>
    %24 = arith.addf %0, %23 : vector<2x4x128xf32>
    %25 = vector.broadcast %8 : vector<2x1x128xf32> to vector<2x4x128xf32>
    %26 = vector.broadcast %12 : vector<1x4x128xf32> to vector<2x4x128xf32>
    %27 = arith.mulf %25, %26 : vector<2x4x128xf32>
    %28 = vector.broadcast %4 : vector<2x1x128xf32> to vector<2x4x128xf32>
    %29 = vector.broadcast %16 : vector<1x4x128xf32> to vector<2x4x128xf32>
    %30 = arith.mulf %28, %29 : vector<2x4x128xf32>
    %31 = arith.addf %27, %30 : vector<2x4x128xf32>
    %32 = arith.addf %0, %31 : vector<2x4x128xf32>
    %c1_i32 = arith.constant 1 : i32
    %c0_10 = arith.constant 0 : index
    %33 = arith.index_cast %c1_i32 : i32 to index
    %c0_11 = arith.constant 0 : index
    %c0_12 = arith.constant 0 : index
    %34 = vector.load %arg2[%c0_10, %33, %c0_11, %c0_12] : memref<2x4x2x128xf32, #tpu.memory_space<vmem>>, vector<1x1x2x128xf32>
    %35 = vector.shape_cast %34 : vector<1x1x2x128xf32> to vector<2x128xf32>
    %36 = vector.shape_cast %35 : vector<2x128xf32> to vector<2x1x128xf32>
    %c1_13 = arith.constant 1 : index
    %37 = arith.index_cast %c1_i32 : i32 to index
    %c0_14 = arith.constant 0 : index
    %c0_15 = arith.constant 0 : index
    %38 = vector.load %arg2[%c1_13, %37, %c0_14, %c0_15] : memref<2x4x2x128xf32, #tpu.memory_space<vmem>>, vector<1x1x2x128xf32>
    %39 = vector.shape_cast %38 : vector<1x1x2x128xf32> to vector<2x128xf32>
    %40 = vector.shape_cast %39 : vector<2x128xf32> to vector<2x1x128xf32>
    %c0_16 = arith.constant 0 : index
    %41 = arith.index_cast %c1_i32 : i32 to index
    %c0_17 = arith.constant 0 : index
    %c0_18 = arith.constant 0 : index
    %42 = vector.load %arg3[%c0_16, %41, %c0_17, %c0_18] : memref<2x4x4x128xf32, #tpu.memory_space<vmem>>, vector<1x1x4x128xf32>
    %43 = vector.shape_cast %42 : vector<1x1x4x128xf32> to vector<4x128xf32>
    %44 = vector.shape_cast %43 : vector<4x128xf32> to vector<1x4x128xf32>
    %c1_19 = arith.constant 1 : index
    %45 = arith.index_cast %c1_i32 : i32 to index
    %c0_20 = arith.constant 0 : index
    %c0_21 = arith.constant 0 : index
    %46 = vector.load %arg3[%c1_19, %45, %c0_20, %c0_21] : memref<2x4x4x128xf32, #tpu.memory_space<vmem>>, vector<1x1x4x128xf32>
    %47 = vector.shape_cast %46 : vector<1x1x4x128xf32> to vector<4x128xf32>
    %48 = vector.shape_cast %47 : vector<4x128xf32> to vector<1x4x128xf32>
    %49 = vector.broadcast %36 : vector<2x1x128xf32> to vector<2x4x128xf32>
    %50 = vector.broadcast %44 : vector<1x4x128xf32> to vector<2x4x128xf32>
    %51 = arith.mulf %49, %50 : vector<2x4x128xf32>
    %52 = vector.broadcast %40 : vector<2x1x128xf32> to vector<2x4x128xf32>
    %53 = vector.broadcast %48 : vector<1x4x128xf32> to vector<2x4x128xf32>
    %54 = arith.mulf %52, %53 : vector<2x4x128xf32>
    %55 = arith.subf %51, %54 : vector<2x4x128xf32>
    %56 = arith.addf %24, %55 : vector<2x4x128xf32>
    %57 = vector.broadcast %40 : vector<2x1x128xf32> to vector<2x4x128xf32>
    %58 = vector.broadcast %44 : vector<1x4x128xf32> to vector<2x4x128xf32>
    %59 = arith.mulf %57, %58 : vector<2x4x128xf32>
    %60 = vector.broadcast %36 : vector<2x1x128xf32> to vector<2x4x128xf32>
    %61 = vector.broadcast %48 : vector<1x4x128xf32> to vector<2x4x128xf32>
    %62 = arith.mulf %60, %61 : vector<2x4x128xf32>
    %63 = arith.addf %59, %62 : vector<2x4x128xf32>
    %64 = arith.addf %32, %63 : vector<2x4x128xf32>
    %c2_i32 = arith.constant 2 : i32
    %c0_22 = arith.constant 0 : index
    %65 = arith.index_cast %c2_i32 : i32 to index
    %c0_23 = arith.constant 0 : index
    %c0_24 = arith.constant 0 : index
    %66 = vector.load %arg2[%c0_22, %65, %c0_23, %c0_24] : memref<2x4x2x128xf32, #tpu.memory_space<vmem>>, vector<1x1x2x128xf32>
    %67 = vector.shape_cast %66 : vector<1x1x2x128xf32> to vector<2x128xf32>
    %68 = vector.shape_cast %67 : vector<2x128xf32> to vector<2x1x128xf32>
    %c1_25 = arith.constant 1 : index
    %69 = arith.index_cast %c2_i32 : i32 to index
    %c0_26 = arith.constant 0 : index
    %c0_27 = arith.constant 0 : index
    %70 = vector.load %arg2[%c1_25, %69, %c0_26, %c0_27] : memref<2x4x2x128xf32, #tpu.memory_space<vmem>>, vector<1x1x2x128xf32>
    %71 = vector.shape_cast %70 : vector<1x1x2x128xf32> to vector<2x128xf32>
    %72 = vector.shape_cast %71 : vector<2x128xf32> to vector<2x1x128xf32>
    %c0_28 = arith.constant 0 : index
    %73 = arith.index_cast %c2_i32 : i32 to index
    %c0_29 = arith.constant 0 : index
    %c0_30 = arith.constant 0 : index
    %74 = vector.load %arg3[%c0_28, %73, %c0_29, %c0_30] : memref<2x4x4x128xf32, #tpu.memory_space<vmem>>, vector<1x1x4x128xf32>
    %75 = vector.shape_cast %74 : vector<1x1x4x128xf32> to vector<4x128xf32>
    %76 = vector.shape_cast %75 : vector<4x128xf32> to vector<1x4x128xf32>
    %c1_31 = arith.constant 1 : index
    %77 = arith.index_cast %c2_i32 : i32 to index
    %c0_32 = arith.constant 0 : index
    %c0_33 = arith.constant 0 : index
    %78 = vector.load %arg3[%c1_31, %77, %c0_32, %c0_33] : memref<2x4x4x128xf32, #tpu.memory_space<vmem>>, vector<1x1x4x128xf32>
    %79 = vector.shape_cast %78 : vector<1x1x4x128xf32> to vector<4x128xf32>
    %80 = vector.shape_cast %79 : vector<4x128xf32> to vector<1x4x128xf32>
    %81 = vector.broadcast %68 : vector<2x1x128xf32> to vector<2x4x128xf32>
    %82 = vector.broadcast %76 : vector<1x4x128xf32> to vector<2x4x128xf32>
    %83 = arith.mulf %81, %82 : vector<2x4x128xf32>
    %84 = vector.broadcast %72 : vector<2x1x128xf32> to vector<2x4x128xf32>
    %85 = vector.broadcast %80 : vector<1x4x128xf32> to vector<2x4x128xf32>
    %86 = arith.mulf %84, %85 : vector<2x4x128xf32>
    %87 = arith.subf %83, %86 : vector<2x4x128xf32>
    %88 = arith.addf %56, %87 : vector<2x4x128xf32>
    %89 = vector.broadcast %72 : vector<2x1x128xf32> to vector<2x4x128xf32>
    %90 = vector.broadcast %76 : vector<1x4x128xf32> to vector<2x4x128xf32>
    %91 = arith.mulf %89, %90 : vector<2x4x128xf32>
    %92 = vector.broadcast %68 : vector<2x1x128xf32> to vector<2x4x128xf32>
    %93 = vector.broadcast %80 : vector<1x4x128xf32> to vector<2x4x128xf32>
    %94 = arith.mulf %92, %93 : vector<2x4x128xf32>
    %95 = arith.addf %91, %94 : vector<2x4x128xf32>
    %96 = arith.addf %64, %95 : vector<2x4x128xf32>
    %c3_i32 = arith.constant 3 : i32
    %c0_34 = arith.constant 0 : index
    %97 = arith.index_cast %c3_i32 : i32 to index
    %c0_35 = arith.constant 0 : index
    %c0_36 = arith.constant 0 : index
    %98 = vector.load %arg2[%c0_34, %97, %c0_35, %c0_36] : memref<2x4x2x128xf32, #tpu.memory_space<vmem>>, vector<1x1x2x128xf32>
    %99 = vector.shape_cast %98 : vector<1x1x2x128xf32> to vector<2x128xf32>
    %100 = vector.shape_cast %99 : vector<2x128xf32> to vector<2x1x128xf32>
    %c1_37 = arith.constant 1 : index
    %101 = arith.index_cast %c3_i32 : i32 to index
    %c0_38 = arith.constant 0 : index
    %c0_39 = arith.constant 0 : index
    %102 = vector.load %arg2[%c1_37, %101, %c0_38, %c0_39] : memref<2x4x2x128xf32, #tpu.memory_space<vmem>>, vector<1x1x2x128xf32>
    %103 = vector.shape_cast %102 : vector<1x1x2x128xf32> to vector<2x128xf32>
    %104 = vector.shape_cast %103 : vector<2x128xf32> to vector<2x1x128xf32>
    %c0_40 = arith.constant 0 : index
    %105 = arith.index_cast %c3_i32 : i32 to index
    %c0_41 = arith.constant 0 : index
    %c0_42 = arith.constant 0 : index
    %106 = vector.load %arg3[%c0_40, %105, %c0_41, %c0_42] : memref<2x4x4x128xf32, #tpu.memory_space<vmem>>, vector<1x1x4x128xf32>
    %107 = vector.shape_cast %106 : vector<1x1x4x128xf32> to vector<4x128xf32>
    %108 = vector.shape_cast %107 : vector<4x128xf32> to vector<1x4x128xf32>
    %c1_43 = arith.constant 1 : index
    %109 = arith.index_cast %c3_i32 : i32 to index
    %c0_44 = arith.constant 0 : index
    %c0_45 = arith.constant 0 : index
    %110 = vector.load %arg3[%c1_43, %109, %c0_44, %c0_45] : memref<2x4x4x128xf32, #tpu.memory_space<vmem>>, vector<1x1x4x128xf32>
    %111 = vector.shape_cast %110 : vector<1x1x4x128xf32> to vector<4x128xf32>
    %112 = vector.shape_cast %111 : vector<4x128xf32> to vector<1x4x128xf32>
    %113 = vector.broadcast %100 : vector<2x1x128xf32> to vector<2x4x128xf32>
    %114 = vector.broadcast %108 : vector<1x4x128xf32> to vector<2x4x128xf32>
    %115 = arith.mulf %113, %114 : vector<2x4x128xf32>
    %116 = vector.broadcast %104 : vector<2x1x128xf32> to vector<2x4x128xf32>
    %117 = vector.broadcast %112 : vector<1x4x128xf32> to vector<2x4x128xf32>
    %118 = arith.mulf %116, %117 : vector<2x4x128xf32>
    %119 = arith.subf %115, %118 : vector<2x4x128xf32>
    %120 = arith.addf %88, %119 : vector<2x4x128xf32>
    %121 = vector.broadcast %104 : vector<2x1x128xf32> to vector<2x4x128xf32>
    %122 = vector.broadcast %108 : vector<1x4x128xf32> to vector<2x4x128xf32>
    %123 = arith.mulf %121, %122 : vector<2x4x128xf32>
    %124 = vector.broadcast %100 : vector<2x1x128xf32> to vector<2x4x128xf32>
    %125 = vector.broadcast %112 : vector<1x4x128xf32> to vector<2x4x128xf32>
    %126 = arith.mulf %124, %125 : vector<2x4x128xf32>
    %127 = arith.addf %123, %126 : vector<2x4x128xf32>
    %128 = arith.addf %96, %127 : vector<2x4x128xf32>
    %c4_i32 = arith.constant 4 : i32
    %c0_46 = arith.constant 0 : index
    %c0_47 = arith.constant 0 : index
    %c0_48 = arith.constant 0 : index
    %c0_49 = arith.constant 0 : index
    %129 = vector.load %arg4[%c0_46, %c0_47, %c0_48, %c0_49] : memref<2x2x4x128xf32, #tpu.memory_space<vmem>>, vector<1x2x4x128xf32>
    %130 = vector.shape_cast %129 : vector<1x2x4x128xf32> to vector<2x4x128xf32>
    %131 = vector.shape_cast %120 : vector<2x4x128xf32> to vector<1x2x4x128xf32>
    tpu.vector_store %arg4[%c0_46, %c0_47, %c0_48, %c0_49], %131 {strides = array<i32>} : memref<2x2x4x128xf32, #tpu.memory_space<vmem>>, vector<1x2x4x128xf32>,
    %c1_50 = arith.constant 1 : index
    %c0_51 = arith.constant 0 : index
    %c0_52 = arith.constant 0 : index
    %c0_53 = arith.constant 0 : index
    %132 = vector.load %arg4[%c1_50, %c0_51, %c0_52, %c0_53] : memref<2x2x4x128xf32, #tpu.memory_space<vmem>>, vector<1x2x4x128xf32>
    %133 = vector.shape_cast %132 : vector<1x2x4x128xf32> to vector<2x4x128xf32>
    %134 = vector.shape_cast %128 : vector<2x4x128xf32> to vector<1x2x4x128xf32>
    tpu.vector_store %arg4[%c1_50, %c0_51, %c0_52, %c0_53], %134 {strides = array<i32>} : memref<2x2x4x128xf32, #tpu.memory_space<vmem>>, vector<1x2x4x128xf32>,
    return
  }
  func.func @transform_0(%arg0: i32, %arg1: i32) -> (i32, i32, i32, i32) {
    %c0_i32 = arith.constant 0 : i32
    %c0_i32_0 = arith.constant 0 : i32
    %c0_i32_1 = arith.constant 0 : i32
    %c0_i32_2 = arith.constant 0 : i32
    return %c0_i32, %c0_i32_0, %arg0, %c0_i32_1 : i32, i32, i32, i32
  }
  func.func @transform_1(%arg0: i32, %arg1: i32) -> (i32, i32, i32, i32) {
    %c0_i32 = arith.constant 0 : i32
    %c0_i32_0 = arith.constant 0 : i32
    %c0_i32_1 = arith.constant 0 : i32
    %c0_i32_2 = arith.constant 0 : i32
    return %c0_i32, %c0_i32_0, %arg1, %c0_i32_1 : i32, i32, i32, i32
  }
  func.func @transform_2(%arg0: i32, %arg1: i32) -> (i32, i32, i32, i32) {
    %c0_i32 = arith.constant 0 : i32
    %c0_i32_0 = arith.constant 0 : i32
    %c0_i32_1 = arith.constant 0 : i32
    return %c0_i32, %arg0, %arg1, %c0_i32_0 : i32, i32, i32, i32
  }
}

</mosaic_0001>

<bundles_post_ra>
// kernel: tpu_custom_call.1
= control target key start
LH: loop header
LB: loop body
LE: loop exit
PB: predicated region body
PF: predicated region fallthrough
CT: control target
= control target key end

     0   :  { %7 = vsyncpa [#allocation3], 0  ;;  %s670_s0 = inlined_call_operand.hbm [shape: f32[2,4,2,128], index: 0, kind: input, shape index: {}]   ;;  %s671_s1 = inlined_call_operand.hbm [shape: f32[2,4,4,128], index: 1, kind: input, shape index: {}]   ;;  %s672_s2 = inlined_call_operand.hbm [shape: f32[2,2,4,128], index: 2, kind: output, shape index: {}]  }
   0x1   :  { %8 = vsyncpa [#allocation6], 0 }
   0x2   :  { %9 = vsyncpa [#allocation4], 0  ;;  %s509_s9 = smov [#allocation2]   ;;  %s437_s13 = scalar_lea.hbm %s670_s0, 256 }
   0x3   :  { %s15_s10 = sshll.u32 %s509_s9, 4  ;;  %p438_p0 = scmp.ne.s32.totalorder %s670_s0, %s437_s13  ;;  %s16_s10 = int_to_ptr.vmem [resolvable:$true] %s15_s10 }
   0x4   :  { %p441_p1 = scmp.lt.u32.totalorder %s437_s13, %s670_s0 }
   0x6   :  { %p443_p2 = pnand %p441_p1, %p438_p0 }
   0x8   :  { %446 = shalt.err (!%p443_p2)
}
   0x9   :  { %s447_s18 = scalar_lea.vmem %s16_s10, 256  ;;  %p452_p4 = scmp.lt.s32.totalorder %s16_s10, %s16_s10 }
   0xa   :  { %p448_p3 = scmp.ne.s32.totalorder %s16_s10, %s447_s18  ;;  %p453_p5 = scmp.lt.s32.totalorder %s447_s18, %s447_s18 }
   0xc   :  { %p454_p6 = por %p453_p5, %p452_p4 }
   0xe   :  { %p455_p7 = pnand %p454_p6, %p448_p3 }
  0x10   :  { %458 = shalt.err (!%p455_p7)
}
  0x11   :  { %s510_s19 = smov 32   ;;  %s511_s20 = smov 2  }
  0x12   :  { %21 = dma.hbm_to_vmem [thread:$0]  %s670_s0, 256, %s16_s10, [#allocation3], %s510_s19, %s510_s19, %s511_s20  }
  0x13   :  { %s512_s23 = smov [#allocation5]   ;;  %s459_s27 = scalar_lea.hbm %s671_s1, 512 }
  0x14   :  { %s27_s24 = sshll.u32 %s512_s23, 4  ;;  %p460_p8 = scmp.ne.s32.totalorder %s671_s1, %s459_s27  ;;  %s28_s24 = int_to_ptr.vmem [resolvable:$true] %s27_s24 }
  0x15   :  { %p463_p9 = scmp.lt.u32.totalorder %s459_s27, %s671_s1 }
  0x17   :  { %p465_p10 = pnand %p463_p9, %p460_p8 }
  0x19   :  { %468 = shalt.err (!%p465_p10)
}
  0x1a   :  { %s469_s4 = scalar_lea.vmem %s28_s24, 512  ;;  %p474_p12 = scmp.lt.s32.totalorder %s28_s24, %s28_s24 }
  0x1b   :  { %p470_p11 = scmp.ne.s32.totalorder %s28_s24, %s469_s4  ;;  %p475_p13 = scmp.lt.s32.totalorder %s469_s4, %s469_s4 }
  0x1d   :  { %p476_p0 = por %p475_p13, %p474_p12 }
  0x1f   :  { %p477_p1 = pnand %p476_p0, %p470_p11 }
  0x21   :  { %480 = shalt.err (!%p477_p1)
}
  0x22   :  { %s513_s0 = smov 64   ;;  %s514_s5 = smov 4  }
  0x23   :  { %33 = dma.hbm_to_vmem [thread:$0]  %s671_s1, 512, %s28_s24, [#allocation6], %s513_s0, %s513_s0, %s514_s5  }
  0x24   :  { %503 = dma.done.wait [#allocation3], 256  }
  0x25   :  { %504 = vsyncadd [#allocation3], 4294967040 }
  0x26   :  { %505 = dma.done.wait [#allocation6], 512  }
  0x27   :  { %506 = vsyncadd [#allocation6], 4294966784  ;;  %v53_v0 = vlaneseq  ;;  %v515_v1 = vmov 1966171168   ;;  %v565_v12 = vld [vmem:[#allocation5] sm:$0xf] }
  0x28   :  { %v51_v2 = vunpack.c.l.s4 %v515_v1  ;;  %v421_v7 = vld.sshfl [vmem:[#allocation2] sm:$0x11 pattern:$0x75316420]  ;;  %v576_v23 = vld [vmem:[#allocation5 + $0x4] sm:$0xf] }
  0x29   :  { %v54_v3 = vshrl.u32 %v53_v0, 7  ;;  %v422_v9 = vld.sshfl [vmem:[#allocation2 + $0x8] sm:$0x11 pattern:$0x75316420]  ;;  %v49_v10 = vcombine.high %v421_v7, %v421_v7  ;;  %s516_s1 = smov [#allocation7]  }
  0x2a   :  { %v52_v4 = vunpack.c.0.s8 %v51_v2  ;;  %v423_v13 = vld.sshfl [vmem:[#allocation2 + $0x2] sm:$0x11 pattern:$0x75316420]  ;;  %v74_v14 = vcombine.high %v422_v9, %v422_v9  ;;  %v581_v28 = vld [vmem:[#allocation5 + $0x14] sm:$0xf] }
  0x2b   :  { %v561_v6 = vsub.s32 0, %v54_v3  ;;  %v567_v15 = vld [vmem:[#allocation5 + $0x10] sm:$0xf]  ;;  %v138_v20 = vcombine.high %v423_v13, %v423_v13  ;;  %v591_v36 = vld [vmem:[#allocation5 + $0x8] sm:$0xf]  ;;  %s408_s8 = sshll.u32 %s516_s1, 4  ;;  %s409_s8 = int_to_ptr.vmem [resolvable:$true] %s408_s8 }
  0x2c   :  { %v559_v5 = vsub.s32 %v52_v4, %v54_v3  ;;  %v424_v18 = vld.sshfl [vmem:[#allocation2 + $0xa] sm:$0x11 pattern:$0x75316420]  ;;  %v606_v49 = vld [vmem:[#allocation5 + $0xc] sm:$0xf]  ;;  %p486_p3 = scmp.lt.s32.totalorder %s409_s8, %s409_s8 }
  0x2d   :  { %v425_v24 = vld.sshfl [vmem:[#allocation2 + $0x4] sm:$0x11 pattern:$0x75316420]  ;;  %v163_v26 = vcombine.high %v424_v18, %v424_v18  ;;  %v597_v40 = vld [vmem:[#allocation5 + $0x18] sm:$0xf] }
  0x2e   :  { %v56_v8 = vrot.slane %v421_v7, %v559_v5  ;;  %v81_v11 = vrot.slane %v422_v9, %v559_v5  ;;  %v145_v17 = vrot.slane %v423_v13, %v559_v5  ;;  %v63_v19 = vrot.slane %v49_v10, %v559_v5  ;;  %v426_v31 = vld.sshfl [vmem:[#allocation2 + $0xc] sm:$0x11 pattern:$0x75316420]  ;;  %s481_s9 = scalar_lea.vmem %s409_s8, 256 }
  0x2f   :  { %v170_v22 = vrot.slane %v424_v18, %v559_v5  ;;  %v88_v25 = vrot.slane %v74_v14, %v559_v5  ;;  %v235_v30 = vrot.slane %v425_v24, %v559_v5  ;;  %v260_v35 = vrot.slane %v426_v31, %v559_v5  ;;  %v427_v37 = vld.sshfl [vmem:[#allocation2 + $0x6] sm:$0x11 pattern:$0x75316420]  ;;  %v609_v51 = vld [vmem:[#allocation5 + $0x1c] sm:$0xf]  ;;  %p482_p2 = scmp.ne.s32.totalorder %s409_s8, %s481_s9  ;;  %p487_p4 = scmp.lt.s32.totalorder %s481_s9, %s481_s9 }
  0x30   :  { %v570_v16 = vrot.slane %v56_v8, %v561_v6  ;;  %v107_v21 = vrot.slane %v81_v11, %v561_v6  ;;  %v185_v29 = vrot.slane %v145_v17, %v561_v6  ;;  %v586_v32 = vrot.slane %v63_v19, %v561_v6  ;;  %v428_v43 = vld.sshfl [vmem:[#allocation2 + $0xe] sm:$0x11 pattern:$0x75316420] }
  0x31   :  { %v197_v34 = vrot.slane %v170_v22, %v561_v6  ;;  %v594_v38 = vrot.slane %v88_v25, %v561_v6  ;;  %v275_v41 = vrot.slane %v235_v30, %v561_v6  ;;  %v325_v42 = vrot.slane %v427_v37, %v559_v5  ;;  %p488_p5 = por %p487_p4, %p486_p3 }
  0x32   :  { %v102_v27 = vmul.f32 %v570_v16, %v565_v12  ;;  %v114_v33 = vmul.f32 %v107_v21, %v567_v15  ;;  %v192_v39 = vmul.f32 %v185_v29, %v576_v23  ;;  %v103_v44 = vmul.f32 %v586_v32, %v565_v12 }
  0x33   :  { %v204_v46 = vmul.f32 %v197_v34, %v581_v28  ;;  %v287_v47 = vrot.slane %v260_v35, %v561_v6  ;;  %v350_v48 = vrot.slane %v428_v43, %v559_v5  ;;  %v282_v50 = vmul.f32 %v275_v41, %v591_v36  ;;  %p489_p6 = pnand %p488_p5, %p482_p2 }
  0x34   :  { %v116_v45 = vsub.f32 %v102_v27, %v114_v33  ;;  %v365_v52 = vrot.slane %v325_v42, %v561_v6  ;;  %v115_v53 = vmul.f32 %v594_v38, %v567_v15  ;;  %v152_v54 = vrot.slane %v138_v20, %v559_v5 }
  0x35   :  { %v206_v55 = vsub.f32 %v192_v39, %v204_v46  ;;  %v294_v56 = vmul.f32 %v287_v47, %v597_v40  ;;  %v377_v57 = vrot.slane %v350_v48, %v561_v6  ;;  %v177_v58 = vrot.slane %v163_v26, %v559_v5 }
  0x36   :  { %v372_v59 = vmul.f32 %v365_v52, %v606_v49  ;;  %v117_v60 = vsub.f32 %v103_v44, %v115_v53  ;;  %v189_v61 = vrot.slane %v152_v54, %v561_v6  ;;  %v228_v62 = vcombine.high %v425_v24, %v425_v24 }
  0x37   :  { %v208_v63 = vadd.f32 %v206_v55, %v116_v45  ;;  %v296_v0 = vsub.f32 %v282_v50, %v294_v56  ;;  %v384_v1 = vmul.f32 %v377_v57, %v609_v51  ;;  %v201_v2 = vrot.slane %v177_v58, %v561_v6 }
  0x38   :  { %v193_v3 = vmul.f32 %v189_v61, %v576_v23  ;;  %v242_v4 = vrot.slane %v228_v62, %v559_v5  ;;  %v253_v7 = vcombine.high %v426_v31, %v426_v31  ;;  %v318_v8 = vcombine.high %v427_v37, %v427_v37 }
  0x39   :  { %v298_v9 = vadd.f32 %v296_v0, %v208_v63  ;;  %v386_v10 = vsub.f32 %v372_v59, %v384_v1  ;;  %v205_v11 = vmul.f32 %v201_v2, %v581_v28  ;;  %v343_v13 = vcombine.high %v428_v43, %v428_v43 }
  0x3a   :  { %v267_v14 = vrot.slane %v253_v7, %v559_v5  ;;  %v279_v17 = vrot.slane %v242_v4, %v561_v6  ;;  %v332_v18 = vrot.slane %v318_v8, %v559_v5  ;;  %v120_v19 = vmul.f32 %v107_v21, %v565_v12 }
  0x3b   :  { %v388_v20 = vadd.f32 %v386_v10, %v298_v9  ;;  %v207_v22 = vsub.f32 %v193_v3, %v205_v11  ;;  %v357_v24 = vrot.slane %v343_v13, %v559_v5  ;;  %v122_v25 = vmul.f32 %v570_v16, %v567_v15 }
  0x3c   :  { %v283_v26 = vmul.f32 %v279_v17, %v591_v36  ;;  %v291_v27 = vrot.slane %v267_v14, %v561_v6  ;;  %v369_v30 = vrot.slane %v332_v18, %v561_v6  ;;  %v210_v31 = vmul.f32 %v197_v34, %v576_v23 }
  0x3d   :  { %398 = vst [vmem:[#allocation7] sm:$0xf] %v388_v20  ;;  %v209_v33 = vadd.f32 %v207_v22, %v117_v60  ;;  %v381_v35 = vrot.slane %v357_v24, %v561_v6  ;;  %v124_v21 = vadd.f32 %v122_v25, %v120_v19  ;;  %v212_v37 = vmul.f32 %v185_v29, %v581_v28 }
  0x3e   :  { %v295_v5 = vmul.f32 %v291_v27, %v597_v40  ;;  %v373_v39 = vmul.f32 %v369_v30, %v606_v49  ;;  %v300_v16 = vmul.f32 %v287_v47, %v591_v36  ;;  %v302_v42 = vmul.f32 %v275_v41, %v597_v40 }
  0x3f   :  { %v385_v43 = vmul.f32 %v381_v35, %v609_v51  ;;  %v214_v44 = vadd.f32 %v212_v37, %v210_v31  ;;  %v390_v34 = vmul.f32 %v377_v57, %v606_v49  ;;  %v392_v45 = vmul.f32 %v365_v52, %v609_v51 }
  0x40   :  { %v297_v46 = vsub.f32 %v283_v26, %v295_v5  ;;  %v304_v6 = vadd.f32 %v302_v42, %v300_v16  ;;  %v121_v29 = vmul.f32 %v594_v38, %v565_v12  ;;  %v123_v48 = vmul.f32 %v586_v32, %v567_v15 }
  0x41   :  { %v387_v50 = vsub.f32 %v373_v39, %v385_v43  ;;  %v216_v53 = vadd.f32 %v214_v44, %v124_v21  ;;  %v394_v47 = vadd.f32 %v392_v45, %v390_v34  ;;  %v211_v41 = vmul.f32 %v201_v2, %v576_v23 }
  0x42   :  { %v299_v54 = vadd.f32 %v297_v46, %v209_v33  ;;  %v125_v55 = vadd.f32 %v123_v48, %v121_v29  ;;  %v213_v56 = vmul.f32 %v189_v61, %v581_v28  ;;  %v301_v57 = vmul.f32 %v291_v27, %v591_v36 }
  0x43   :  { %v306_v52 = vadd.f32 %v304_v6, %v216_v53  ;;  %v303_v58 = vmul.f32 %v279_v17, %v597_v40  ;;  %v391_v59 = vmul.f32 %v381_v35, %v606_v49  ;;  %v393_v12 = vmul.f32 %v369_v30, %v609_v51 }
  0x44   :  { %v389_v38 = vadd.f32 %v387_v50, %v299_v54  ;;  %v215_v15 = vadd.f32 %v213_v56, %v211_v41 }
  0x45   :  { %v396_v32 = vadd.f32 %v394_v47, %v306_v52  ;;  %v305_v60 = vadd.f32 %v303_v58, %v301_v57  ;;  %v395_v23 = vadd.f32 %v393_v12, %v391_v59 }
  0x46   :  { %399 = vst [vmem:[#allocation7 + $0x4] sm:$0xf] %v389_v38  ;;  %v217_v62 = vadd.f32 %v215_v15, %v125_v55 }
  0x47   :  { %401 = vst [vmem:[#allocation7 + $0x8] sm:$0xf] %v396_v32 }
  0x48   :  { %v307_v28 = vadd.f32 %v305_v60, %v217_v62 }
  0x4a   :  { %v397_v61 = vadd.f32 %v395_v23, %v307_v28 }
  0x4c   :  { %402 = vst [vmem:[#allocation7 + $0xc] sm:$0xf] %v397_v61 }
  0x4d   :  { %492 = shalt.err (!%p489_p6)
}
  0x4e   :  { %s493_s12 = scalar_lea.hbm %s672_s2, 256 }
  0x4f   :  { %p494_p7 = scmp.ne.s32.totalorder %s672_s2, %s493_s12  ;;  %p497_p8 = scmp.lt.u32.totalorder %s493_s12, %s672_s2 }
  0x51   :  { %p499_p9 = pnand %p497_p8, %p494_p7 }
  0x53   :  { %502 = shalt.err (!%p499_p9)
}
  0x54   :  { %414 = dma.vmem_to_hbm [thread:$0]  %s409_s8, 256, %s672_s2, [#allocation4], %s513_s0, %s513_s0, %s514_s5  }
  0x55   :  { %507 = dma.done.wait [#allocation4], 256  }
  0x56   :  { %508 = vsyncadd [#allocation4], 4294967040 }
  0x57   :  { %418 = vsyncpa [#allocation3], 1 }
  0x58   :  { %419 = vsyncpa [#allocation6], 1 }
  0x59   :  { %420 = vsyncpa [#allocation4], 1 }

</bundles_post_ra>
